<compile_context>
chip_gen: v5e
topology: v5e:2x2
jax: 0.10.0
libtpu: 0.0.40
codegen_flags: <defaults>
</compile_context>

<pallas_src>
import functools

import jax
import jax.numpy as jnp
from jax import lax
from jax.experimental import pallas as pl
from jax.experimental.pallas import tpu as pltpu

LANE = 128


def _round_up(n, m):
    return (n + m - 1) // m * m


# ----------------------------------------------------------------------------
# Fused single-stage kernel (grid = (batch, layer))
# ----------------------------------------------------------------------------
def _stage_kernel(x_in_ref, mask_ref, w_in_ref, b_in_ref,
                  wd_ref, bd_ref, w1_ref, b1_ref, w_out_ref, b_out_ref,
                  o_ref, x_ref, halo_ref, xcat_ref,
                  *, num_layers, T, T_p, C_p, H):
    # x_in_ref : (1, dim, T_p) bf16     mask_ref : (1, 1, T_p) f32
    # w_in_ref : (C_p, dim)    bf16     b_in_ref : (C_p, 1)    f32
    # wd_ref   : (1, C_p, 3C_p) bf16    bd_ref   : (1, C_p, 1) f32   (layer l block)
    # w1_ref   : (1, C_p, C_p)  bf16    b1_ref   : (1, C_p, 1) f32   (layer l block)
    # w_out_ref: (Cout_p, C_p) bf16     b_out_ref: (Cout_p, 1) f32
    # o_ref    : (1, Cout_p, T_p) f32
    # x_ref    : (C_p, T_p) f32 scratch            (running activation, persists over l)
    # halo_ref : (C_p, T_p + 2H) bf16 scratch      (zero margins, center = activation)
    # xcat_ref : (3*C_p, T_p) bf16 scratch         (stacked taps: x[t-d]; x[t]; x[t+d])
    l = pl.program_id(1)
    m = mask_ref[0]                                                   # (1, T_p) f32

    def input_conv():
        x0 = jnp.dot(w_in_ref[...], x_in_ref[0],
                     preferred_element_type=jnp.float32) + b_in_ref[...]
        if T < T_p:
            # Padded time columns would otherwise equal b_in and leak into the
            # x[t+d] tap of layer 0 -> force them to zero (real-T semantics).
            col = lax.broadcasted_iota(jnp.int32, (1, T_p), 1)
            x0 = jnp.where(col < T, x0, 0.0)
        return x0                                                     # (C_p, T_p) f32

    def out_conv(xf):
        out = jnp.dot(w_out_ref[...], xf.astype(jnp.bfloat16),
                      preferred_element_type=jnp.float32) + b_out_ref[...]
        o_ref[0] = out * m                                            # (Cout_p, T_p)

    if num_layers == 0:                                               # degenerate stage
        out_conv(input_conv())
        return

    @pl.when(l == 0)
    def _():
        x_ref[...] = input_conv()
        halo_ref[...] = jnp.zeros_like(halo_ref)   # zero margins (center rewritten below)

    x = x_ref[...]                                                    # (C_p, T_p) f32
    xb = x.astype(jnp.bfloat16)

    # Refresh the halo center and the center tap with this layer's activation.
    halo_ref[:, H:H + T_p] = xb
    xcat_ref[C_p:2 * C_p, :] = xb

    # Stage the two shifted taps from the halo (static offsets per dilation).
    for i in range(num_layers):
        d = 2 ** i

        @pl.when(l == i)
        def _(d=d):
            xcat_ref[0:C_p, :] = halo_ref[:, H - d:H - d + T_p]       # x[t - d]
            xcat_ref[2 * C_p:, :] = halo_ref[:, H + d:H + d + T_p]    # x[t + d]

    # Dilated k=3 conv as ONE MXU dot with K = 3*C_p (no K padding to 128).
    h = jnp.dot(wd_ref[0], xcat_ref[...],
                preferred_element_type=jnp.float32) + bd_ref[0]       # (C_p, T_p) f32
    h = jnp.maximum(h, 0.0)                                           # ReLU
    y = jnp.dot(w1_ref[0], h.astype(jnp.bfloat16),
                preferred_element_type=jnp.float32) + b1_ref[0]       # 1x1 conv
    # Dropout: eval mode -> identity.
    xn = (x + y) * m                                                  # residual + mask
    x_ref[...] = xn

    @pl.when(l == num_layers - 1)
    def _():
        out_conv(xn)


# ----------------------------------------------------------------------------
# Wrapper
# ----------------------------------------------------------------------------
def single_stage_forward(x, mask, params):
    """x: (B, dim, T), mask: (B, K, T)  ->  (B, num_classes, T)."""
    B, dim, T = x.shape
    num_layers = len(params["layers"])
    C = params["w_in"].shape[0]                     # num_f_maps
    num_classes = params["w_out"].shape[0]

    C_p = _round_up(C, 16)                          # bf16 sublane packing granule
    Cout_p = _round_up(num_classes, 8)
    T_p = _round_up(T, LANE)
    d_max = 2 ** (num_layers - 1) if num_layers > 0 else 1
    H = _round_up(d_max, LANE)                      # lane-aligned halo margin

    # Inputs at the HBM boundary: native (B, C, T) layout, only T padded to 128.
    xt = jnp.pad(x.astype(jnp.float32), ((0, 0), (0, 0), (0, T_p - T))).astype(jnp.bfloat16)
    mt = jnp.pad(mask[:, 0:1, :].astype(jnp.float32), ((0, 0), (0, 0), (0, T_p - T)))

    def pad_rows(w, rows):
        return jnp.pad(w, ((0, rows - w.shape[0]), (0, 0)))

    w_in = pad_rows(params["w_in"], C_p).astype(jnp.bfloat16)                 # (C_p, dim)
    b_in = pad_rows(params["b_in"].reshape(-1, 1), C_p).astype(jnp.float32)   # (C_p, 1)
    w_out = jnp.pad(params["w_out"],
                    ((0, Cout_p - num_classes), (0, C_p - C))).astype(jnp.bfloat16)
    b_out = pad_rows(params["b_out"].reshape(-1, 1), Cout_p).astype(jnp.float32)

    if num_layers > 0:
        wd_l, bd_l, w1_l, b1_l = [], [], [], []
        for lp in params["layers"]:
            # PyTorch Conv1d weight (out, in, k): wd[:, :, k] is tap k (x[t+(k-1)d]).
            wd = jnp.pad(lp["wd"], ((0, C_p - C), (0, C_p - C), (0, 0)))      # (C_p,C_p,3)
            wd_l.append(jnp.concatenate([wd[:, :, 0], wd[:, :, 1], wd[:, :, 2]], axis=1))
            bd_l.append(pad_rows(lp["bd"].reshape(-1, 1), C_p))
            w1_l.append(jnp.pad(lp["w1"], ((0, C_p - C), (0, C_p - C))))
            b1_l.append(pad_rows(lp["b1"].reshape(-1, 1), C_p))
        wd_all = jnp.stack(wd_l).astype(jnp.bfloat16)                 # (L, C_p, 3*C_p)
        bd_all = jnp.stack(bd_l).astype(jnp.float32)                  # (L, C_p, 1)
        w1_all = jnp.stack(w1_l).astype(jnp.bfloat16)                 # (L, C_p, C_p)
        b1_all = jnp.stack(b1_l).astype(jnp.float32)                  # (L, C_p, 1)
    else:  # dummy (unused) stacks so specs stay non-empty
        wd_all = jnp.zeros((1, C_p, 3 * C_p), jnp.bfloat16)
        bd_all = jnp.zeros((1, C_p, 1), jnp.float32)
        w1_all = jnp.zeros((1, C_p, C_p), jnp.bfloat16)
        b1_all = jnp.zeros((1, C_p, 1), jnp.float32)
    L_grid = max(num_layers, 1)

    # Explicit VMEM budget (blocks are double-buffered, + scratch, + temp headroom).
    halo_w = T_p + 2 * H
    vmem_est = 2 * (dim * T_p * 2 + T_p * 4 + C_p * dim * 2 + C_p * 4
                    + C_p * 3 * C_p * 2 + C_p * 4 + C_p * C_p * 2 + C_p * 4
                    + Cout_p * C_p * 2 + Cout_p * 4 + Cout_p * T_p * 4)
    vmem_est += C_p * T_p * 4 + C_p * halo_w * 2 + 3 * C_p * T_p * 2
    vmem_est += 8 * C_p * T_p * 4 + (4 << 20)
    vmem_limit = int(min(max(vmem_est, 32 << 20), 64 << 20))

    kernel = functools.partial(_stage_kernel, num_layers=num_layers,
                               T=T, T_p=T_p, C_p=C_p, H=H)
    out = pl.pallas_call(
        kernel,
        out_shape=jax.ShapeDtypeStruct((B, Cout_p, T_p), jnp.float32),
        grid=(B, L_grid),
        in_specs=[
            pl.BlockSpec((1, dim, T_p), lambda b, l: (b, 0, 0)),      # x (resident over l)
            pl.BlockSpec((1, 1, T_p), lambda b, l: (b, 0, 0)),        # mask
            pl.BlockSpec((C_p, dim), lambda b, l: (0, 0)),            # w_in
            pl.BlockSpec((C_p, 1), lambda b, l: (0, 0)),              # b_in
            pl.BlockSpec((1, C_p, 3 * C_p), lambda b, l: (l, 0, 0)),  # wd (streamed per layer)
            pl.BlockSpec((1, C_p, 1), lambda b, l: (l, 0, 0)),        # bd
            pl.BlockSpec((1, C_p, C_p), lambda b, l: (l, 0, 0)),      # w1
            pl.BlockSpec((1, C_p, 1), lambda b, l: (l, 0, 0)),        # b1
            pl.BlockSpec((Cout_p, C_p), lambda b, l: (0, 0)),         # w_out
            pl.BlockSpec((Cout_p, 1), lambda b, l: (0, 0)),           # b_out
        ],
        out_specs=pl.BlockSpec((1, Cout_p, T_p), lambda b, l: (b, 0, 0)),
        scratch_shapes=[
            pltpu.VMEM((C_p, T_p), jnp.float32),                      # running activation
            pltpu.VMEM((C_p, T_p + 2 * H), jnp.bfloat16),             # halo-padded activation
            pltpu.VMEM((3 * C_p, T_p), jnp.bfloat16),                 # stacked taps
        ],
        compiler_params=pltpu.CompilerParams(
            dimension_semantics=("parallel", "arbitrary"),
            vmem_limit_bytes=vmem_limit),
    )(xt, mt, w_in, b_in, wd_all, bd_all, w1_all, b1_all, w_out, b_out)

    return out[:, :num_classes, :T]                                   # (B, classes, T)


# ----------------------------------------------------------------------------
# Params (PyTorch Conv1d orientation) + pure-JAX reference at MXU precision
# ----------------------------------------------------------------------------
def init_params(key, num_layers, num_f_maps, dim, num_classes):
    ks = jax.random.split(key, 4 + 4 * num_layers)
    s = 0.1
    params = {
        "w_in": s * jax.random.normal(ks[0], (num_f_maps, dim), jnp.float32),
        "b_in": s * jax.random.normal(ks[1], (num_f_maps,), jnp.float32),
        "w_out": s * jax.random.normal(ks[2], (num_classes, num_f_maps), jnp.float32),
        "b_out": s * jax.random.normal(ks[3], (num_classes,), jnp.float32),
        "layers": [],
    }
    for i in range(num_layers):
        k0, k1, k2, k3 = ks[4 + 4 * i: 8 + 4 * i]
        params["layers"].append({
            # Conv1d weight layout (out_ch, in_ch, kernel): wd[:, :, k] = tap k.
            "wd": s * jax.random.normal(k0, (num_f_maps, num_f_maps, 3), jnp.float32),
            "bd": s * jax.random.normal(k1, (num_f_maps,), jnp.float32),
            "w1": s * jax.random.normal(k2, (num_f_maps, num_f_maps), jnp.float32),
            "b1": s * jax.random.normal(k3, (num_f_maps,), jnp.float32),
        })
    return params


def reference_forward(x, mask, params):
    """Pure-JAX reference mirroring the module math at MXU precision
    (bf16 matmul operands, f32 accumulation / elementwise)."""
    bf = jnp.bfloat16

    def conv1x1(w, b, a):  # w (O, I), b (O,), a (B, I, T) -> (B, O, T)
        r = jnp.einsum("oi,bit->bot", w.astype(bf), a.astype(bf),
                       preferred_element_type=jnp.float32)
        return r + b.reshape(1, -1, 1)

    m = mask[:, 0:1, :].astype(jnp.float32)
    out = conv1x1(params["w_in"], params["b_in"], x)
    B, C, T = out.shape
    zb = jnp.zeros((C,), jnp.float32)
    for i, lp in enumerate(params["layers"]):
        d = 2 ** i
        if d >= T:
            x_m = jnp.zeros_like(out)
            x_p = jnp.zeros_like(out)
        else:
            z = jnp.zeros((B, C, d), out.dtype)
            x_m = jnp.concatenate([z, out[:, :, : T - d]], axis=2)    # x[t - d]
            x_p = jnp.concatenate([out[:, :, d:], z], axis=2)         # x[t + d]
        h = (conv1x1(lp["wd"][:, :, 0], zb, x_m)
             + conv1x1(lp["wd"][:, :, 1], lp["bd"], out)
             + conv1x1(lp["wd"][:, :, 2], zb, x_p))
        h = jax.nn.relu(h)
        y = conv1x1(lp["w1"], lp["b1"], h)
        out = (out + y) * m
    return conv1x1(params["w_out"], params["b_out"], out) * m


if __name__ == "__main__":
    num_layers, num_f_maps, dim, num_classes = 3, 32, 16, 8
    B, T = 2, 16                                    # T < 128 exercises the time-padding path

    key = jax.random.PRNGKey(0)
    kx, km, kp = jax.random.split(key, 3)
    x = jax.random.normal(kx, (B, dim, T), jnp.float32)
    mask = jnp.ones((B, num_classes, T), jnp.float32)
    mask = mask.at[1, :, 10:].set(0.0)              # second sequence padded after t=10
    params = init_params(kp, num_layers, num_f_maps, dim, num_classes)

    out = jax.block_until_ready(single_stage_forward(x, mask, params))
    ref = jax.block_until_ready(reference_forward(x, mask, params))

    assert out.shape == (B, num_classes, T)
    max_err = float(jnp.max(jnp.abs(out - ref)))
    assert jnp.allclose(out, ref, atol=2e-3, rtol=2e-3), f"mismatch vs reference: {max_err}"

    print("KERNEL_OK")
</pallas_src>

<mosaic_0001>
module attributes {stable_mosaic.version = 11 : i64} {
  func.func @_stage_kernel(%arg0: i32, %arg1: i32, %arg2: memref<1x16x128xbf16, #tpu.memory_space<vmem>>, %arg3: memref<1x1x128xf32, #tpu.memory_space<vmem>>, %arg4: memref<32x16xbf16, #tpu.memory_space<vmem>>, %arg5: memref<32x1xf32, #tpu.memory_space<vmem>>, %arg6: memref<1x32x96xbf16, #tpu.memory_space<vmem>>, %arg7: memref<1x32x1xf32, #tpu.memory_space<vmem>>, %arg8: memref<1x32x32xbf16, #tpu.memory_space<vmem>>, %arg9: memref<1x32x1xf32, #tpu.memory_space<vmem>>, %arg10: memref<8x32xbf16, #tpu.memory_space<vmem>>, %arg11: memref<8x1xf32, #tpu.memory_space<vmem>>, %arg12: memref<1x8x128xf32, #tpu.memory_space<vmem>>, %arg13: memref<32x128xf32, #tpu.memory_space<vmem>>, %arg14: memref<32x384xbf16, #tpu.memory_space<vmem>>, %arg15: memref<96x128xbf16, #tpu.memory_space<vmem>>) attributes {dimension_semantics = [#tpu.dimension_semantics<parallel>, #tpu.dimension_semantics<arbitrary>], iteration_bounds = array<i64: 2, 3>, scalar_prefetch = 0 : i64, scratch_operands = 3 : i64, tpu.core_type = #tpu.core_type<tc>, window_params = [{transform_indices = @transform_0, window_bounds = array<i64: 1, 16, 128>}, {transform_indices = @transform_1, window_bounds = array<i64: 1, 1, 128>}, {pipeline_mode = #tpu.pipeline_mode<synchronous>, transform_indices = @transform_2, window_bounds = array<i64: 32, 16>}, {pipeline_mode = #tpu.pipeline_mode<synchronous>, transform_indices = @transform_3, window_bounds = array<i64: 32, 1>}, {transform_indices = @transform_4, window_bounds = array<i64: 1, 32, 96>}, {transform_indices = @transform_5, window_bounds = array<i64: 1, 32, 1>}, {transform_indices = @transform_6, window_bounds = array<i64: 1, 32, 32>}, {transform_indices = @transform_7, window_bounds = array<i64: 1, 32, 1>}, {pipeline_mode = #tpu.pipeline_mode<synchronous>, transform_indices = @transform_8, window_bounds = array<i64: 8, 32>}, {pipeline_mode = #tpu.pipeline_mode<synchronous>, transform_indices = @transform_9, window_bounds = array<i64: 8, 1>}, {transform_indices = @transform_10, window_bounds = array<i64: 1, 8, 128>}]} {
    %c0 = arith.constant 0 : index
    %c0_0 = arith.constant 0 : index
    %c0_1 = arith.constant 0 : index
    %0 = vector.load %arg3[%c0, %c0_0, %c0_1] : memref<1x1x128xf32, #tpu.memory_space<vmem>>, vector<1x1x128xf32>
    %1 = vector.shape_cast %0 : vector<1x1x128xf32> to vector<1x128xf32>
    %c0_i32 = arith.constant 0 : i32
    %2 = arith.cmpi eq, %arg1, %c0_i32 : i32
    %3 = arith.extui %2 : i1 to i32
    %c0_i32_2 = arith.constant 0 : i32
    %4 = arith.cmpi ne, %3, %c0_i32_2 : i32
    scf.if %4 {
      %c0_31 = arith.constant 0 : index
      %c0_32 = arith.constant 0 : index
      %43 = vector.load %arg4[%c0_31, %c0_32] : memref<32x16xbf16, #tpu.memory_space<vmem>>, vector<32x16xbf16>
      %c0_33 = arith.constant 0 : index
      %c0_34 = arith.constant 0 : index
      %c0_35 = arith.constant 0 : index
      %44 = vector.load %arg2[%c0_33, %c0_34, %c0_35] : memref<1x16x128xbf16, #tpu.memory_space<vmem>>, vector<1x16x128xbf16>
      %45 = vector.shape_cast %44 : vector<1x16x128xbf16> to vector<16x128xbf16>
      %cst_36 = arith.constant dense<0.000000e+00> : vector<32x128xf32>
      %46 = tpu.matmul %43, %45, %cst_36 {dimension_numbers = #tpu.dot_dimension_numbers<[1], [0], [0], [1], [0, 0, 1, 1], [], []>} : vector<32x16xbf16>, vector<16x128xbf16>, vector<32x128xf32> -> vector<32x128xf32>
      %c0_37 = arith.constant 0 : index
      %c0_38 = arith.constant 0 : index
      %47 = vector.load %arg5[%c0_37, %c0_38] : memref<32x1xf32, #tpu.memory_space<vmem>>, vector<32x1xf32>
      %48 = vector.broadcast %47 : vector<32x1xf32> to vector<32x128xf32>
      %49 = arith.addf %46, %48 : vector<32x128xf32>
      %50 = tpu.iota {dimensions = array<i32: 1>} : vector<1x128xi32>
      %c16_i32 = arith.constant 16 : i32
      %51 = vector.broadcast %c16_i32 : i32 to vector<1x128xi32>
      %52 = arith.cmpi slt, %50, %51 : vector<1x128xi32>
      %cst_39 = arith.constant 0.000000e+00 : f32
      %53 = vector.shape_cast %52 : vector<1x128xi1> to vector<1x128xi1>
      %54 = vector.broadcast %53 : vector<1x128xi1> to vector<32x128xi1>
      %55 = vector.broadcast %cst_39 : f32 to vector<32x128xf32>
      %56 = arith.select %54, %49, %55 : vector<32x128xi1>, vector<32x128xf32>
      %c0_40 = arith.constant 0 : index
      %c0_41 = arith.constant 0 : index
      %57 = vector.load %arg13[%c0_40, %c0_41] : memref<32x128xf32, #tpu.memory_space<vmem>>, vector<32x128xf32>
      tpu.vector_store %arg13[%c0_40, %c0_41], %56 {strides = array<i32>} : memref<32x128xf32, #tpu.memory_space<vmem>>, vector<32x128xf32>,
      %cst_42 = arith.constant 0.000000e+00 : bf16
      %58 = vector.broadcast %cst_42 : bf16 to vector<32x384xbf16>
      %c0_43 = arith.constant 0 : index
      %c0_44 = arith.constant 0 : index
      %59 = vector.load %arg14[%c0_43, %c0_44] : memref<32x384xbf16, #tpu.memory_space<vmem>>, vector<32x384xbf16>
      tpu.vector_store %arg14[%c0_43, %c0_44], %58 {strides = array<i32>} : memref<32x384xbf16, #tpu.memory_space<vmem>>, vector<32x384xbf16>,
    } else {
    }
    %c0_3 = arith.constant 0 : index
    %c0_4 = arith.constant 0 : index
    %5 = vector.load %arg13[%c0_3, %c0_4] : memref<32x128xf32, #tpu.memory_space<vmem>>, vector<32x128xf32>
    %6 = arith.truncf %5 : vector<32x128xf32> to vector<32x128xbf16>
    %c0_5 = arith.constant 0 : index
    %c128 = arith.constant 128 : index
    %7 = vector.load %arg14[%c0_5, %c128] : memref<32x384xbf16, #tpu.memory_space<vmem>>, vector<32x128xbf16>
    tpu.vector_store %arg14[%c0_5, %c128], %6 {strides = array<i32>} : memref<32x384xbf16, #tpu.memory_space<vmem>>, vector<32x128xbf16>,
    %c32 = arith.constant 32 : index
    %c0_6 = arith.constant 0 : index
    %8 = vector.load %arg15[%c32, %c0_6] : memref<96x128xbf16, #tpu.memory_space<vmem>>, vector<32x128xbf16>
    tpu.vector_store %arg15[%c32, %c0_6], %6 {strides = array<i32>} : memref<96x128xbf16, #tpu.memory_space<vmem>>, vector<32x128xbf16>,
    %c0_i32_7 = arith.constant 0 : i32
    %9 = arith.cmpi eq, %arg1, %c0_i32_7 : i32
    %10 = arith.extui %9 : i1 to i32
    %c0_i32_8 = arith.constant 0 : i32
    %11 = arith.cmpi ne, %10, %c0_i32_8 : i32
    scf.if %11 {
      %c0_31 = arith.constant 0 : index
      %c127 = arith.constant 127 : index
      %43 = vector.load %arg14[%c0_31, %c127] : memref<32x384xbf16, #tpu.memory_space<vmem>>, vector<32x128xbf16>
      %c0_32 = arith.constant 0 : index
      %c0_33 = arith.constant 0 : index
      %44 = vector.load %arg15[%c0_32, %c0_33] : memref<96x128xbf16, #tpu.memory_space<vmem>>, vector<32x128xbf16>
      tpu.vector_store %arg15[%c0_32, %c0_33], %43 {strides = array<i32>} : memref<96x128xbf16, #tpu.memory_space<vmem>>, vector<32x128xbf16>,
      %c0_34 = arith.constant 0 : index
      %c129 = arith.constant 129 : index
      %45 = vector.load %arg14[%c0_34, %c129] : memref<32x384xbf16, #tpu.memory_space<vmem>>, vector<32x128xbf16>
      %c64 = arith.constant 64 : index
      %c0_35 = arith.constant 0 : index
      %46 = vector.load %arg15[%c64, %c0_35] : memref<96x128xbf16, #tpu.memory_space<vmem>>, vector<32x128xbf16>
      tpu.vector_store %arg15[%c64, %c0_35], %45 {strides = array<i32>} : memref<96x128xbf16, #tpu.memory_space<vmem>>, vector<32x128xbf16>,
    } else {
    }
    %c1_i32 = arith.constant 1 : i32
    %12 = arith.cmpi eq, %arg1, %c1_i32 : i32
    %13 = arith.extui %12 : i1 to i32
    %c0_i32_9 = arith.constant 0 : i32
    %14 = arith.cmpi ne, %13, %c0_i32_9 : i32
    scf.if %14 {
      %c0_31 = arith.constant 0 : index
      %c126 = arith.constant 126 : index
      %43 = vector.load %arg14[%c0_31, %c126] : memref<32x384xbf16, #tpu.memory_space<vmem>>, vector<32x128xbf16>
      %c0_32 = arith.constant 0 : index
      %c0_33 = arith.constant 0 : index
      %44 = vector.load %arg15[%c0_32, %c0_33] : memref<96x128xbf16, #tpu.memory_space<vmem>>, vector<32x128xbf16>
      tpu.vector_store %arg15[%c0_32, %c0_33], %43 {strides = array<i32>} : memref<96x128xbf16, #tpu.memory_space<vmem>>, vector<32x128xbf16>,
      %c0_34 = arith.constant 0 : index
      %c130 = arith.constant 130 : index
      %45 = vector.load %arg14[%c0_34, %c130] : memref<32x384xbf16, #tpu.memory_space<vmem>>, vector<32x128xbf16>
      %c64 = arith.constant 64 : index
      %c0_35 = arith.constant 0 : index
      %46 = vector.load %arg15[%c64, %c0_35] : memref<96x128xbf16, #tpu.memory_space<vmem>>, vector<32x128xbf16>
      tpu.vector_store %arg15[%c64, %c0_35], %45 {strides = array<i32>} : memref<96x128xbf16, #tpu.memory_space<vmem>>, vector<32x128xbf16>,
    } else {
    }
    %c2_i32 = arith.constant 2 : i32
    %15 = arith.cmpi eq, %arg1, %c2_i32 : i32
    %16 = arith.extui %15 : i1 to i32
    %c0_i32_10 = arith.constant 0 : i32
    %17 = arith.cmpi ne, %16, %c0_i32_10 : i32
    scf.if %17 {
      %c0_31 = arith.constant 0 : index
      %c124 = arith.constant 124 : index
      %43 = vector.load %arg14[%c0_31, %c124] : memref<32x384xbf16, #tpu.memory_space<vmem>>, vector<32x128xbf16>
      %c0_32 = arith.constant 0 : index
      %c0_33 = arith.constant 0 : index
      %44 = vector.load %arg15[%c0_32, %c0_33] : memref<96x128xbf16, #tpu.memory_space<vmem>>, vector<32x128xbf16>
      tpu.vector_store %arg15[%c0_32, %c0_33], %43 {strides = array<i32>} : memref<96x128xbf16, #tpu.memory_space<vmem>>, vector<32x128xbf16>,
      %c0_34 = arith.constant 0 : index
      %c132 = arith.constant 132 : index
      %45 = vector.load %arg14[%c0_34, %c132] : memref<32x384xbf16, #tpu.memory_space<vmem>>, vector<32x128xbf16>
      %c64 = arith.constant 64 : index
      %c0_35 = arith.constant 0 : index
      %46 = vector.load %arg15[%c64, %c0_35] : memref<96x128xbf16, #tpu.memory_space<vmem>>, vector<32x128xbf16>
      tpu.vector_store %arg15[%c64, %c0_35], %45 {strides = array<i32>} : memref<96x128xbf16, #tpu.memory_space<vmem>>, vector<32x128xbf16>,
    } else {
    }
    %c0_11 = arith.constant 0 : index
    %c0_12 = arith.constant 0 : index
    %c0_13 = arith.constant 0 : index
    %18 = vector.load %arg6[%c0_11, %c0_12, %c0_13] : memref<1x32x96xbf16, #tpu.memory_space<vmem>>, vector<1x32x96xbf16>
    %19 = vector.shape_cast %18 : vector<1x32x96xbf16> to vector<32x96xbf16>
    %c0_14 = arith.constant 0 : index
    %c0_15 = arith.constant 0 : index
    %20 = vector.load %arg15[%c0_14, %c0_15] : memref<96x128xbf16, #tpu.memory_space<vmem>>, vector<96x128xbf16>
    %cst = arith.constant dense<0.000000e+00> : vector<32x128xf32>
    %21 = tpu.matmul %19, %20, %cst {dimension_numbers = #tpu.dot_dimension_numbers<[1], [0], [0], [1], [0, 0, 1, 1], [], []>} : vector<32x96xbf16>, vector<96x128xbf16>, vector<32x128xf32> -> vector<32x128xf32>
    %c0_16 = arith.constant 0 : index
    %c0_17 = arith.constant 0 : index
    %c0_18 = arith.constant 0 : index
    %22 = vector.load %arg7[%c0_16, %c0_17, %c0_18] : memref<1x32x1xf32, #tpu.memory_space<vmem>>, vector<1x32x1xf32>
    %23 = vector.shape_cast %22 : vector<1x32x1xf32> to vector<32x1xf32>
    %24 = vector.broadcast %23 : vector<32x1xf32> to vector<32x128xf32>
    %25 = arith.addf %21, %24 : vector<32x128xf32>
    %cst_19 = arith.constant 0.000000e+00 : f32
    %26 = vector.broadcast %cst_19 : f32 to vector<32x128xf32>
    %27 = arith.maximumf %25, %26 : vector<32x128xf32>
    %c0_20 = arith.constant 0 : index
    %c0_21 = arith.constant 0 : index
    %c0_22 = arith.constant 0 : index
    %28 = vector.load %arg8[%c0_20, %c0_21, %c0_22] : memref<1x32x32xbf16, #tpu.memory_space<vmem>>, vector<1x32x32xbf16>
    %29 = vector.shape_cast %28 : vector<1x32x32xbf16> to vector<32x32xbf16>
    %30 = arith.truncf %27 : vector<32x128xf32> to vector<32x128xbf16>
    %cst_23 = arith.constant dense<0.000000e+00> : vector<32x128xf32>
    %31 = tpu.matmul %29, %30, %cst_23 {dimension_numbers = #tpu.dot_dimension_numbers<[1], [0], [0], [1], [0, 0, 1, 1], [], []>} : vector<32x32xbf16>, vector<32x128xbf16>, vector<32x128xf32> -> vector<32x128xf32>
    %c0_24 = arith.constant 0 : index
    %c0_25 = arith.constant 0 : index
    %c0_26 = arith.constant 0 : index
    %32 = vector.load %arg9[%c0_24, %c0_25, %c0_26] : memref<1x32x1xf32, #tpu.memory_space<vmem>>, vector<1x32x1xf32>
    %33 = vector.shape_cast %32 : vector<1x32x1xf32> to vector<32x1xf32>
    %34 = vector.broadcast %33 : vector<32x1xf32> to vector<32x128xf32>
    %35 = arith.addf %31, %34 : vector<32x128xf32>
    %36 = arith.addf %5, %35 : vector<32x128xf32>
    %37 = vector.broadcast %1 : vector<1x128xf32> to vector<32x128xf32>
    %38 = arith.mulf %36, %37 : vector<32x128xf32>
    %c0_27 = arith.constant 0 : index
    %c0_28 = arith.constant 0 : index
    %39 = vector.load %arg13[%c0_27, %c0_28] : memref<32x128xf32, #tpu.memory_space<vmem>>, vector<32x128xf32>
    tpu.vector_store %arg13[%c0_27, %c0_28], %38 {strides = array<i32>} : memref<32x128xf32, #tpu.memory_space<vmem>>, vector<32x128xf32>,
    %c2_i32_29 = arith.constant 2 : i32
    %40 = arith.cmpi eq, %arg1, %c2_i32_29 : i32
    %41 = arith.extui %40 : i1 to i32
    %c0_i32_30 = arith.constant 0 : i32
    %42 = arith.cmpi ne, %41, %c0_i32_30 : i32
    scf.if %42 {
      %c0_31 = arith.constant 0 : index
      %c0_32 = arith.constant 0 : index
      %43 = vector.load %arg10[%c0_31, %c0_32] : memref<8x32xbf16, #tpu.memory_space<vmem>>, vector<8x32xbf16>
      %44 = arith.truncf %38 : vector<32x128xf32> to vector<32x128xbf16>
      %cst_33 = arith.constant dense<0.000000e+00> : vector<8x128xf32>
      %45 = tpu.matmul %43, %44, %cst_33 {dimension_numbers = #tpu.dot_dimension_numbers<[1], [0], [0], [1], [0, 0, 1, 1], [], []>} : vector<8x32xbf16>, vector<32x128xbf16>, vector<8x128xf32> -> vector<8x128xf32>
      %c0_34 = arith.constant 0 : index
      %c0_35 = arith.constant 0 : index
      %46 = vector.load %arg11[%c0_34, %c0_35] : memref<8x1xf32, #tpu.memory_space<vmem>>, vector<8x1xf32>
      %47 = vector.broadcast %46 : vector<8x1xf32> to vector<8x128xf32>
      %48 = arith.addf %45, %47 : vector<8x128xf32>
      %49 = vector.broadcast %1 : vector<1x128xf32> to vector<8x128xf32>
      %50 = arith.mulf %48, %49 : vector<8x128xf32>
      %c0_36 = arith.constant 0 : index
      %c0_37 = arith.constant 0 : index
      %c0_38 = arith.constant 0 : index
      %51 = vector.load %arg12[%c0_36, %c0_37, %c0_38] : memref<1x8x128xf32, #tpu.memory_space<vmem>>, vector<1x8x128xf32>
      %52 = vector.shape_cast %51 : vector<1x8x128xf32> to vector<8x128xf32>
      %53 = vector.shape_cast %50 : vector<8x128xf32> to vector<1x8x128xf32>
      tpu.vector_store %arg12[%c0_36, %c0_37, %c0_38], %53 {strides = array<i32>} : memref<1x8x128xf32, #tpu.memory_space<vmem>>, vector<1x8x128xf32>,
    } else {
    }
    return
  }
  func.func @transform_0(%arg0: i32, %arg1: i32) -> (i32, i32, i32) {
    %c0_i32 = arith.constant 0 : i32
    %c0_i32_0 = arith.constant 0 : i32
    %c0_i32_1 = arith.constant 0 : i32
    return %arg0, %c0_i32, %c0_i32_0 : i32, i32, i32
  }
  func.func @transform_1(%arg0: i32, %arg1: i32) -> (i32, i32, i32) {
    %c0_i32 = arith.constant 0 : i32
    %c0_i32_0 = arith.constant 0 : i32
    %c0_i32_1 = arith.constant 0 : i32
    return %arg0, %c0_i32, %c0_i32_0 : i32, i32, i32
  }
  func.func @transform_2(%arg0: i32, %arg1: i32) -> (i32, i32) {
    %c0_i32 = arith.constant 0 : i32
    %c0_i32_0 = arith.constant 0 : i32
    %c0_i32_1 = arith.constant 0 : i32
    return %c0_i32, %c0_i32_0 : i32, i32
  }
  func.func @transform_3(%arg0: i32, %arg1: i32) -> (i32, i32) {
    %c0_i32 = arith.constant 0 : i32
    %c0_i32_0 = arith.constant 0 : i32
    %c0_i32_1 = arith.constant 0 : i32
    return %c0_i32, %c0_i32_0 : i32, i32
  }
  func.func @transform_4(%arg0: i32, %arg1: i32) -> (i32, i32, i32) {
    %c0_i32 = arith.constant 0 : i32
    %c0_i32_0 = arith.constant 0 : i32
    %c0_i32_1 = arith.constant 0 : i32
    return %arg1, %c0_i32, %c0_i32_0 : i32, i32, i32
  }
  func.func @transform_5(%arg0: i32, %arg1: i32) -> (i32, i32, i32) {
    %c0_i32 = arith.constant 0 : i32
    %c0_i32_0 = arith.constant 0 : i32
    %c0_i32_1 = arith.constant 0 : i32
    return %arg1, %c0_i32, %c0_i32_0 : i32, i32, i32
  }
  func.func @transform_6(%arg0: i32, %arg1: i32) -> (i32, i32, i32) {
    %c0_i32 = arith.constant 0 : i32
    %c0_i32_0 = arith.constant 0 : i32
    %c0_i32_1 = arith.constant 0 : i32
    return %arg1, %c0_i32, %c0_i32_0 : i32, i32, i32
  }
  func.func @transform_7(%arg0: i32, %arg1: i32) -> (i32, i32, i32) {
    %c0_i32 = arith.constant 0 : i32
    %c0_i32_0 = arith.constant 0 : i32
    %c0_i32_1 = arith.constant 0 : i32
    return %arg1, %c0_i32, %c0_i32_0 : i32, i32, i32
  }
  func.func @transform_8(%arg0: i32, %arg1: i32) -> (i32, i32) {
    %c0_i32 = arith.constant 0 : i32
    %c0_i32_0 = arith.constant 0 : i32
    %c0_i32_1 = arith.constant 0 : i32
    return %c0_i32, %c0_i32_0 : i32, i32
  }
  func.func @transform_9(%arg0: i32, %arg1: i32) -> (i32, i32) {
    %c0_i32 = arith.constant 0 : i32
    %c0_i32_0 = arith.constant 0 : i32
    %c0_i32_1 = arith.constant 0 : i32
    return %c0_i32, %c0_i32_0 : i32, i32
  }
  func.func @transform_10(%arg0: i32, %arg1: i32) -> (i32, i32, i32) {
    %c0_i32 = arith.constant 0 : i32
    %c0_i32_0 = arith.constant 0 : i32
    %c0_i32_1 = arith.constant 0 : i32
    return %arg0, %c0_i32, %c0_i32_0 : i32, i32, i32
  }
}

</mosaic_0001>

<bundles_post_ra>
// kernel: tpu_custom_call.1
= control target key start
LH: loop header
LB: loop body
LE: loop exit
PB: predicated region body
PF: predicated region fallthrough
CT: control target
= control target key end

     0   :  { %s1767_s0 = inlined_call_operand.vmem [shape: bf16[2,16,128], index: 0, kind: input, shape index: {}]   ;;  %s1768_s1 = inlined_call_operand.vmem [shape: f32[2,1,128], index: 1, kind: input, shape index: {}]   ;;  %s1769_s2 = inlined_call_operand.vmem [shape: bf16[32,16], index: 2, kind: input, shape index: {}]   ;;  %s1770_s3 = inlined_call_operand.vmem [shape: f32[32,1], index: 3, kind: input, shape index: {}]   ;;  %s1771_s4 = inlined_call_operand.vmem [shape: bf16[3,32,96], index: 4, kind: input, shape index: {}]   ;;  %s1772_s5 = inlined_call_operand.vmem [shape: f32[3,32,1], index: 5, kind: input, shape index: {}]   ;;  %s1773_s6 = inlined_call_operand.vmem [shape: bf16[3,32,32], index: 6, kind: input, shape index: {}]   ;;  %s1774_s7 = inlined_call_operand.vmem [shape: f32[3,32,1], index: 7, kind: input, shape index: {}]   ;;  %s1775_s8 = inlined_call_operand.vmem [shape: bf16[8,32], index: 8, kind: input, shape index: {}]   ;;  %s1776_s9 = inlined_call_operand.vmem [shape: f32[8,1], index: 9, kind: input, shape index: {}]   ;;  %s1777_s10 = inlined_call_operand.hbm [shape: f32[2,8,128], index: 10, kind: output, shape index: {}]  }
   0x1   :  { %1790 = sst [smem:[#allocation18_spill]] %s1777_s10 }
   0x2   :  { %15 = vsyncpa [#allocation6], 0 }
   0x3   :  { %17 = vsyncpa [#allocation6 + $0x1], 0  ;;  %s1525_s13 = smov 0   ;;  %s1527_s14 = smov 0  }
   0x4   :  { %s1529_s15 = smov 0   ;;  %s1531_s16 = smov 0  }
   0x5   :  { %s1533_s17 = smov 0   ;;  %s1535_s18 = smov 0  }
   0x6   :  { %s1537_s19 = smov 0   ;;  %s1539_s20 = smov 0  }
   0x7 LB: > { %1791 = sst [smem:[#allocation8_spill]] %s1431_s13  ;;  %s1158_s21 = sadd.s32 4294967295, %s1459_s20   ;;  %s1459_s20 = sphi %s1539_s20, %s23_s20   ;;  %s1455_s19 = sphi %s1537_s19, %s1818_s19   ;;  %s1451_s18 = sphi %s1535_s18, %s1817_s18   ;;  %s1447_s17 = sphi %s1533_s17, %s1812_s17   ;;  %s1443_s16 = sphi %s1531_s16, %s1811_s16   ;;  %s1439_s15 = sphi %s1529_s15, %s1810_s15   ;;  %s1435_s14 = sphi %s1527_s14, %s1816_s14   ;;  %s1431_s13 = sphi %s1525_s13, %s1815_s13  }
   0x8   : > { %1792 = sst [smem:[#allocation9_spill]] %s1439_s15  ;;  %s1159_s22 = sadd.s32 4294967294, %s1459_s20  }
   0x9   : > { %1793 = sst [smem:[#allocation10_spill]] %s1451_s18  ;;  %s32_s23 = sadd.s32 1, %s1451_s18 }
   0xa   : > { %1794 = sst [smem:[#allocation11_spill]] %s1455_s19  ;;  %p33_p0 = scmp.ge.s32.totalorder %s32_s23, 3 }
   0xb   : > { %1795 = sst [smem:[#allocation12_spill]] %s1459_s20  ;;  %s35_s24 = sadd.s32 1, %s1455_s19 }
   0xc   : > { %p292_p1 = scmp.ne.s32.totalorder %s1439_s15, %s1435_s14  ;;  %p293_p2 = scmp.eq.s32.totalorder %s1158_s21, 5 }
   0xd   : > { %s1820_s23 = smov (%p33_p0, %s32_s23), 0  ;;  %s1822_s24 = smov (!%p33_p0, %s35_s24), %s1455_s19 }
   0xe   : > { %1796 = sst [smem:[#allocation13_spill]] %s1820_s23  ;;  %p1574_p3 = por %p293_p2, %p292_p1 }
   0xf   : > { %p298_p4 = scmp.ne.s32.totalorder %s1435_s14, %s1431_s13  ;;  %p37_p5 = scmp.ge.s32.totalorder %s1822_s24, 2 }
  0x10   : > { %s1797_s25 = scalar_select %p1574_p3, 1, 0 }
  0x11   : > { %p299_p6 = scmp.eq.s32.totalorder %s1159_s22, 5  ;;  %p1162_p7 = scmp.ge.s32.totalorder %s1459_s20, 1 }
  0x12   : > { %1798 = sst [smem:[#allocation14_spill]] %s1797_s25  ;;  %p375_p8 = scmp.lt.s32.totalorder %s1459_s20, 7 }
  0x13   : > { %s1824_s24 = smov (%p37_p5, %s1822_s24), 0  ;;  %p1584_p9 = por %p299_p6, %p298_p4 }
  0x14   : > { %1799 = sst [smem:[#allocation15_spill]] %s1824_s24  ;;  %p376_p10 = pnand %p1162_p7, %p375_p8 }
  0x15   : > { %s1800_s26 = scalar_select %p1584_p9, 1, 0 }
  0x16   : > { %s279_s27 = ssub.s32 %s1455_s19, %s1824_s24  ;;  %s282_s28 = sadd.s32 1, %s1439_s15 }
  0x17   : > { %1801 = sst [smem:[#allocation16_spill]] %s1800_s26  ;;  %p280_p11 = scmp.eq.s32.totalorder %s279_s27, 0 }
  0x18   : > { %379 = sbr.rel (%p376_p10) target bundleno = 1125 (0x465), region = 60  ;;  %s1783_s30 = sand.u32 (!%p376_p10), 1, %s1435_s14  }
  0x19   : > { %s1592_s29 = scalar_select %p280_p11, %s1439_s15, %s282_s28  }
  0x1a   : > { %p436_p12 = scmp.lt.s32.totalorder (!%p376_p10), %s1447_s17, 1  ;;  %s1598_s11 = sshll.u32 (!%p376_p10), %s1783_s30, 3 }
  0x1b   : > { %1802 = sst [smem:[#allocation17_spill]] %s1592_s29  ;;  %p444_p13 = scmp.lt.s32.totalorder (!%p376_p10), %s1443_s16, 2 }
  0x1c   : > { %p1174_p0 = scmp.ne.s32.totalorder (!%p376_p10), %s1443_s16, 0 }
  0x1d   : > { %s437_s12 = scalar_select %p436_p12, %s1447_s17, 1 }
  0x1e   : > { %s445_s21 = scalar_select %p444_p13, %s1443_s16, 2 }
  0x1f   : > { %s1242_s22 = sshll.u32 %s437_s12, 3  ;;  %s443_s24 = scalar_lea.vmem %s1768_s1, %s437_s12 }
  0x20   : > { %s440_s18 = scalar_lea.vmem %s1767_s0, %s1242_s22  ;;  %s1243_s29 = sshll.u32 %s445_s21, 4  ;;  %v1609_v0 = vld [vmem:[%s443_s24] sm:$0x1] }
  0x21   : > { %s1614_s30 = scalar_lea.vmem %s1771_s4, %s1243_s29  ;;  %s1244_s13 = sshll.u32 %s445_s21, 5 }
  0x22   : > { %s1619_s25 = scalar_lea.vmem %s1772_s5, %s1244_s13  ;;  %s1624_s28 = scalar_lea.vmem %s1773_s6, %s1243_s29 }
  0x23   : > { %s1629_s24 = scalar_lea.vmem %s1774_s7, %s1244_s13  ;;  %s435_s22 = scalar_lea.vmem [#allocation5], %s1598_s11 }
  0x24   : > { %469 = sbr.rel (%p1174_p0) target bundleno = 185 (0xb9), region = 64 }
  0x29   : > { %v1249_v1 = vld [vmem:[%s440_s18] sm:$0xff]  ;;  %v1248_v3 = vld [vmem:[%s1769_s2 + $0x8] sm:$0xff]  ;;  %v1461_v4 = vmov 0   ;;  %v478_v5 = vld [vmem:[%s1770_s3 + $0x10] sm:$0xff]  ;;  %vm516_vm0 = vcmask 130048   ;;  %v542_v9 = vlaneseq }
  0x2a   : > { %v1247_v2 = vld [vmem:[%s1769_s2] sm:$0xff]  ;;  %1360 = vset.pattern.permute.xlu1 %v1461_v4  ;;  %555 = vst [vmem:[#allocation3] sm:$0xff] %v1461_v4  ;;  %1359 = vset.pattern.permute.xlu0 %v1461_v4  ;;  %v479_v7 = vld [vmem:[%s1770_s3 + $0x18] sm:$0xff]  ;;  %v477_v8 = vld [vmem:[%s1770_s3 + $0x8] sm:$0xff] }
  0x2b   : > { %v476_v6 = vld [vmem:[%s1770_s3] sm:$0xff]  ;;  %530 = vmatpush.bf16.msra.mxu0 %v1249_v1  ;;  %1272 = vmatpush.bf16.msra.mxu1 %v1249_v1  ;;  %556 = vst [vmem:[#allocation3 + $0x8] sm:$0xf] %v1461_v4  ;;  %v543_v10 = vand.u32 127, %v542_v9 }
  0x2c   : > { %557 = vst [vmem:[#allocation3 + $0xc] sm:$0xff] %v1461_v4  ;;  %492 = vperm.xlu1 %1360, %v478_v5   ;;  %482 = vperm.xlu0 %1359, %v476_v6  }
  0x2d   : > { %558 = vst [vmem:[#allocation3 + $0x14] sm:$0xf] %v1461_v4  ;;  %vm544_vm1 = vcmp.lt.s32.totalorder %v543_v10, 16 }
  0x2e   : > { %1187 = vmatmul.msk.bf16.vlgmr.msra.gmra.mxu0 %vm516_vm0, %v1247_v2  ;;  %1188 = vmatmul.msk.bf16.vlgmr.msra.gmra.mxu1 %vm516_vm0, %v1248_v3  ;;  %559 = vst [vmem:[#allocation3 + $0x18] sm:$0xff] %v1461_v4 }
  0x2f   : > { %560 = vst [vmem:[#allocation3 + $0x20] sm:$0xf] %v1461_v4 }
  0x30   : > { %561 = vst [vmem:[#allocation3 + $0x24] sm:$0xff] %v1461_v4 }
  0x31   : > { %562 = vst [vmem:[#allocation3 + $0x2c] sm:$0xf] %v1461_v4 }
  0x34   : > { %497 = vperm.xlu1 %1360, %v479_v7   ;;  %487 = vperm.xlu0 %1359, %v477_v8  }
  0x9e   : > { %v493_v11 = vpop.permute.xlu1 %492  ;;  %v483_v12 = vpop.permute.xlu0 %482 }
  0xa6   : > { %v498_v19 = vpop.permute.xlu1 %497  ;;  %v488_v20 = vpop.permute.xlu0 %487 }
  0xab   : > { %v532_v13 = vpop.f32.mrf.mxu0  ;;  %v537_v14 = vpop.f32.mrf.mxu1 }
  0xac   : > { %v533_v15 = vadd.f32 %v532_v13, %v483_v12  ;;  %v538_v16 = vadd.f32 %v537_v14, %v493_v11 }
  0xae   : > { %v547_v17 = vsel %vm544_vm1, %v533_v15, 0.0  ;;  %v549_v18 = vsel %vm544_vm1, %v538_v16, 0.0 }
  0xaf   : > { %551 = vst [vmem:[#allocation2 + $0x10] sm:$0xff] %v547_v17 }
  0xb0   : > { %553 = vst [vmem:[#allocation2 + $0x18] sm:$0xff] %v549_v18 }
  0xb3   : > { %v534_v21 = vpop.f32.mrf.mxu0  ;;  %v539_v22 = vpop.f32.mrf.mxu1 }
  0xb4   : > { %v535_v23 = vadd.f32 %v534_v21, %v488_v20  ;;  %v540_v24 = vadd.f32 %v539_v22, %v498_v19 }
  0xb6   : > { %v548_v25 = vsel %vm544_vm1, %v535_v23, 0.0  ;;  %v550_v26 = vsel %vm544_vm1, %v540_v24, 0.0 }
  0xb7   : > { %552 = vst [vmem:[#allocation2] sm:$0xff] %v548_v25 }
  0xb8   : > { %554 = vst [vmem:[#allocation2 + $0x8] sm:$0xff] %v550_v26 }
  0xb9 PF: > { %v1653_v27 = vld [vmem:[#allocation2 + $0x10] sm:$0xff]  ;;  %v1657_v29 = vld [vmem:[#allocation2 + $0x18] sm:$0xff]  ;;  %s1462_s10 = smov (!%p1174_p0), 1   ;;  %s1463_s15 = smov (!%p1174_p0), 127  }
  0xba   : > { %v567_v30 = vpack.c.bf16 %v1653_v27, %v1653_v27  ;;  %v569_v32 = vpack.c.bf16 %v1657_v29, %v1657_v29 }
  0xbc   : > { %571 = vst [vmem:[#allocation3 + $0x4] sm:$0xf] %v567_v30 }
  0xbd   : > { %573 = vst [vmem:[#allocation3 + $0x1c] sm:$0xf] %v569_v32 }
  0xbe   : > { %v1655_v28 = vld [vmem:[#allocation2] sm:$0xff] }
  0xbf   : > { %v568_v31 = vpack.c.bf16 %v1655_v28, %v1655_v28  ;;  %v1665_v33 = vld [vmem:[#allocation2 + $0x8] sm:$0xff]  ;;  %v1263_v35 = vpack.c.bf16 %v1655_v28, %v1653_v27 }
  0xc0   : > { %v570_v34 = vpack.c.bf16 %v1665_v33, %v1665_v33  ;;  %v1268_v36 = vpack.c.bf16 %v1665_v33, %v1657_v29  ;;  %581 = sbr.rel (%p1174_p0) target bundleno = 334 (0x14e), region = 68 }
  0xc1   : > { %572 = vst [vmem:[#allocation3 + $0x10] sm:$0xf] %v568_v31 }
  0xc2   : > { %574 = vst [vmem:[#allocation3 + $0x28] sm:$0xf] %v570_v34 }
  0xc3   : > { %1270 = vst [vmem:[#allocation4 + $0x10] sm:$0xff] %v1263_v35  }
  0xc4   : > { %1271 = vst [vmem:[#allocation4 + $0x18] sm:$0xff] %v1268_v36  }
  0xc5   : > { %v584_v37 = vld [vmem:[#allocation3 + $0x18] sm:$0xff]  ;;  %v582_v38 = vld [vmem:[#allocation3] sm:$0xff]  ;;  %vm635_vm2 = vcmask 1039360   ;;  %vm602_vm3 = vcmask 7168  }
  0xc6   : > { %594 = vrot.lane.b32.xlu1 %v584_v37, %s1462_s10  ;;  %590 = vrot.lane.b32.xlu0 %v582_v38, %s1462_s10  ;;  %v615_v39 = vld [vmem:[#allocation3 + $0x4] sm:$0xff]  ;;  %v617_v44 = vld [vmem:[#allocation3 + $0x1c] sm:$0xff] }
  0xc7   : > { %623 = vrot.lane.b32.xlu2 %v615_v39, %s1463_s15 }
  0xc8   : > { %v583_v41 = vld [vmem:[#allocation3 + $0xc] sm:$0xff] }
  0xc9   : > { %v585_v40 = vld [vmem:[#allocation3 + $0x24] sm:$0xff]  ;;  %v616_v42 = vld [vmem:[#allocation3 + $0x10] sm:$0xff] }
  0xca   : > { %v618_v43 = vld [vmem:[#allocation3 + $0x28] sm:$0xff] }
  0xce   : > { %596 = vrot.lane.b32.xlu1 %v585_v40, %s1462_s10  ;;  %592 = vrot.lane.b32.xlu0 %v583_v41, %s1462_s10 }
  0xcf   : > { %625 = vrot.lane.b32.xlu2 %v616_v42, %s1463_s15 }
  0xd6   : > { %629 = vrot.lane.b32.xlu1 %v618_v43, %s1463_s15  ;;  %627 = vrot.lane.b32.xlu0 %v617_v44, %s1463_s15 }
 0x121   : > { %v624_v45 = vpop.permute.xlu2 %623 }
 0x122   : > { %v631_v46 = vrot.slane %v624_v45, 4 }
 0x124   : > { %v636_v47 = vsel %vm635_vm2, %v624_v45, %v631_v46 }
 0x125   : > { %644 = vst [vmem:[#allocation4 + $0x20] sm:$0xf] %v636_v47 }
 0x129   : > { %v626_v48 = vpop.permute.xlu2 %625 }
 0x12a   : > { %v632_v49 = vrot.slane %v626_v48, 4 }
 0x12c   : > { %v637_v50 = vsel %vm635_vm2, %v626_v48, %v632_v49 }
 0x12d   : > { %645 = vst [vmem:[#allocation4 + $0x24] sm:$0xf] %v637_v50 }
 0x138   : > { %v595_v51 = vpop.permute.xlu1 %594  ;;  %v591_v52 = vpop.permute.xlu0 %590 }
 0x139   : > { %v600_v53 = vrot.slane %v595_v51, 4  ;;  %v598_v54 = vrot.slane %v591_v52, 4 }
 0x13b   : > { %v605_v55 = vsel %vm602_vm3, %v595_v51, %v600_v53  ;;  %v603_v56 = vsel %vm602_vm3, %v591_v52, %v598_v54 }
 0x13c   : > { %613 = vst [vmem:[#allocation4 + $0x8] sm:$0xf] %v605_v55 }
 0x13d   : > { %611 = vst [vmem:[#allocation4] sm:$0xf] %v603_v56 }
 0x140   : > { %v597_v57 = vpop.permute.xlu1 %596  ;;  %v593_v58 = vpop.permute.xlu0 %592 }
 0x141   : > { %v601_v59 = vrot.slane %v597_v57, 4  ;;  %v599_v60 = vrot.slane %v593_v58, 4 }
 0x143   : > { %v606_v61 = vsel %vm602_vm3, %v597_v57, %v601_v59  ;;  %v604_v62 = vsel %vm602_vm3, %v593_v58, %v599_v60 }
 0x144   : > { %614 = vst [vmem:[#allocation4 + $0xc] sm:$0xf] %v606_v61 }
 0x145   : > { %612 = vst [vmem:[#allocation4 + $0x4] sm:$0xf] %v604_v62 }
 0x148   : > { %v630_v63 = vpop.permute.xlu1 %629  ;;  %v628_v1 = vpop.permute.xlu0 %627 }
 0x149   : > { %v634_v2 = vrot.slane %v630_v63, 4  ;;  %v633_v3 = vrot.slane %v628_v1, 4 }
 0x14b   : > { %v639_v4 = vsel %vm635_vm2, %v630_v63, %v634_v2  ;;  %v638_v5 = vsel %vm635_vm2, %v628_v1, %v633_v3 }
 0x14c   : > { %647 = vst [vmem:[#allocation4 + $0x2c] sm:$0xf] %v639_v4 }
 0x14d   : > { %646 = vst [vmem:[#allocation4 + $0x28] sm:$0xf] %v638_v5 }
 0x14e PF: > { %p1190_p1 = scmp.ne.s32.totalorder %s1443_s16, 1 }
 0x14f   : > { %s1464_s20 = smov (!%p1190_p1), 2   ;;  %s1465_s26 = smov (!%p1190_p1), 126  }
 0x150   : > { %651 = sbr.rel (%p1190_p1) target bundleno = 478 (0x1de), region = 72 }
 0x155   : > { %v654_v6 = vld [vmem:[#allocation3 + $0x18] sm:$0xff]  ;;  %v652_v7 = vld [vmem:[#allocation3] sm:$0xff]  ;;  %v653_v10 = vld [vmem:[#allocation3 + $0xc] sm:$0xff]  ;;  %vm705_vm4 = vcmask 1031168   ;;  %vm672_vm5 = vcmask 15360  }
 0x156   : > { %664 = vrot.lane.b32.xlu1 %v654_v6, %s1464_s20  ;;  %660 = vrot.lane.b32.xlu0 %v652_v7, %s1464_s20  ;;  %v685_v8 = vld [vmem:[#allocation3 + $0x4] sm:$0xff]  ;;  %v686_v11 = vld [vmem:[#allocation3 + $0x10] sm:$0xff]  ;;  %v687_v13 = vld [vmem:[#allocation3 + $0x1c] sm:$0xff] }
 0x157   : > { %693 = vrot.lane.b32.xlu2 %v685_v8, %s1465_s26  ;;  %v655_v9 = vld [vmem:[#allocation3 + $0x24] sm:$0xff] }
 0x158   : > { %v688_v12 = vld [vmem:[#allocation3 + $0x28] sm:$0xff] }
 0x15e   : > { %666 = vrot.lane.b32.xlu1 %v655_v9, %s1464_s20  ;;  %662 = vrot.lane.b32.xlu0 %v653_v10, %s1464_s20 }
 0x15f   : > { %695 = vrot.lane.b32.xlu2 %v686_v11, %s1465_s26 }
 0x166   : > { %699 = vrot.lane.b32.xlu1 %v688_v12, %s1465_s26  ;;  %697 = vrot.lane.b32.xlu0 %v687_v13, %s1465_s26 }
 0x1b1   : > { %v694_v14 = vpop.permute.xlu2 %693 }
 0x1b2   : > { %v701_v15 = vrot.slane %v694_v14, 4 }
 0x1b4   : > { %v706_v16 = vsel %vm705_vm4, %v694_v14, %v701_v15 }
 0x1b5   : > { %714 = vst [vmem:[#allocation4 + $0x20] sm:$0xf] %v706_v16 }
 0x1b9   : > { %v696_v17 = vpop.permute.xlu2 %695 }
 0x1ba   : > { %v702_v18 = vrot.slane %v696_v17, 4 }
 0x1bc   : > { %v707_v19 = vsel %vm705_vm4, %v696_v17, %v702_v18 }
 0x1bd   : > { %715 = vst [vmem:[#allocation4 + $0x24] sm:$0xf] %v707_v19 }
 0x1c8   : > { %v665_v20 = vpop.permute.xlu1 %664  ;;  %v661_v21 = vpop.permute.xlu0 %660 }
 0x1c9   : > { %v670_v22 = vrot.slane %v665_v20, 4  ;;  %v668_v23 = vrot.slane %v661_v21, 4 }
 0x1cb   : > { %v675_v24 = vsel %vm672_vm5, %v665_v20, %v670_v22  ;;  %v673_v25 = vsel %vm672_vm5, %v661_v21, %v668_v23 }
 0x1cc   : > { %683 = vst [vmem:[#allocation4 + $0x8] sm:$0xf] %v675_v24 }
 0x1cd   : > { %681 = vst [vmem:[#allocation4] sm:$0xf] %v673_v25 }
 0x1d0   : > { %v667_v26 = vpop.permute.xlu1 %666  ;;  %v663_v30 = vpop.permute.xlu0 %662 }
 0x1d1   : > { %v671_v31 = vrot.slane %v667_v26, 4  ;;  %v669_v32 = vrot.slane %v663_v30, 4 }
 0x1d3   : > { %v676_v34 = vsel %vm672_vm5, %v667_v26, %v671_v31  ;;  %v674_v35 = vsel %vm672_vm5, %v663_v30, %v669_v32 }
 0x1d4   : > { %684 = vst [vmem:[#allocation4 + $0xc] sm:$0xf] %v676_v34 }
 0x1d5   : > { %682 = vst [vmem:[#allocation4 + $0x4] sm:$0xf] %v674_v35 }
 0x1d8   : > { %v700_v36 = vpop.permute.xlu1 %699  ;;  %v698_v37 = vpop.permute.xlu0 %697 }
 0x1d9   : > { %v704_v38 = vrot.slane %v700_v36, 4  ;;  %v703_v39 = vrot.slane %v698_v37, 4 }
 0x1db   : > { %v709_v40 = vsel %vm705_vm4, %v700_v36, %v704_v38  ;;  %v708_v41 = vsel %vm705_vm4, %v698_v37, %v703_v39 }
 0x1dc   : > { %717 = vst [vmem:[#allocation4 + $0x2c] sm:$0xf] %v709_v40 }
 0x1dd   : > { %716 = vst [vmem:[#allocation4 + $0x28] sm:$0xf] %v708_v41 }
 0x1de PF: > { %p1191_p2 = scmp.ne.s32.totalorder %s1443_s16, 2 }
 0x1df   : > { %s1466_s13 = smov (!%p1191_p2), 4   ;;  %s1467_s29 = smov (!%p1191_p2), 124  }
 0x1e0   : > { %721 = sbr.rel (%p1191_p2) target bundleno = 622 (0x26e), region = 76 }
 0x1e5   : > { %v724_v42 = vld [vmem:[#allocation3 + $0x18] sm:$0xff]  ;;  %v722_v43 = vld [vmem:[#allocation3] sm:$0xff]  ;;  %v723_v46 = vld [vmem:[#allocation3 + $0xc] sm:$0xff]  ;;  %vm775_vm6 = vcmask 1014784   ;;  %vm742_vm7 = vcmask 31744  }
 0x1e6   : > { %734 = vrot.lane.b32.xlu1 %v724_v42, %s1466_s13  ;;  %730 = vrot.lane.b32.xlu0 %v722_v43, %s1466_s13  ;;  %v755_v44 = vld [vmem:[#allocation3 + $0x4] sm:$0xff]  ;;  %v756_v47 = vld [vmem:[#allocation3 + $0x10] sm:$0xff]  ;;  %v757_v49 = vld [vmem:[#allocation3 + $0x1c] sm:$0xff] }
 0x1e7   : > { %763 = vrot.lane.b32.xlu2 %v755_v44, %s1467_s29  ;;  %v725_v45 = vld [vmem:[#allocation3 + $0x24] sm:$0xff] }
 0x1e8   : > { %v758_v48 = vld [vmem:[#allocation3 + $0x28] sm:$0xff] }
 0x1ee   : > { %736 = vrot.lane.b32.xlu1 %v725_v45, %s1466_s13  ;;  %732 = vrot.lane.b32.xlu0 %v723_v46, %s1466_s13 }
 0x1ef   : > { %765 = vrot.lane.b32.xlu2 %v756_v47, %s1467_s29 }
 0x1f6   : > { %769 = vrot.lane.b32.xlu1 %v758_v48, %s1467_s29  ;;  %767 = vrot.lane.b32.xlu0 %v757_v49, %s1467_s29 }
 0x241   : > { %v764_v50 = vpop.permute.xlu2 %763 }
 0x242   : > { %v771_v51 = vrot.slane %v764_v50, 4 }
 0x244   : > { %v776_v52 = vsel %vm775_vm6, %v764_v50, %v771_v51 }
 0x245   : > { %784 = vst [vmem:[#allocation4 + $0x20] sm:$0xf] %v776_v52 }
 0x249   : > { %v766_v53 = vpop.permute.xlu2 %765 }
 0x24a   : > { %v772_v54 = vrot.slane %v766_v53, 4 }
 0x24c   : > { %v777_v55 = vsel %vm775_vm6, %v766_v53, %v772_v54 }
 0x24d   : > { %785 = vst [vmem:[#allocation4 + $0x24] sm:$0xf] %v777_v55 }
 0x258   : > { %v735_v56 = vpop.permute.xlu1 %734  ;;  %v731_v57 = vpop.permute.xlu0 %730 }
 0x259   : > { %v740_v58 = vrot.slane %v735_v56, 4  ;;  %v738_v59 = vrot.slane %v731_v57, 4 }
 0x25b   : > { %v745_v60 = vsel %vm742_vm7, %v735_v56, %v740_v58  ;;  %v743_v61 = vsel %vm742_vm7, %v731_v57, %v738_v59 }
 0x25c   : > { %753 = vst [vmem:[#allocation4 + $0x8] sm:$0xf] %v745_v60 }
 0x25d   : > { %751 = vst [vmem:[#allocation4] sm:$0xf] %v743_v61 }
 0x260   : > { %v737_v62 = vpop.permute.xlu1 %736  ;;  %v733_v63 = vpop.permute.xlu0 %732 }
 0x261   : > { %v741_v1 = vrot.slane %v737_v62, 4  ;;  %v739_v2 = vrot.slane %v733_v63, 4 }
 0x263   : > { %v746_v3 = vsel %vm742_vm7, %v737_v62, %v741_v1  ;;  %v744_v4 = vsel %vm742_vm7, %v733_v63, %v739_v2 }
 0x264   : > { %754 = vst [vmem:[#allocation4 + $0xc] sm:$0xf] %v746_v3 }
 0x265   : > { %752 = vst [vmem:[#allocation4 + $0x4] sm:$0xf] %v744_v4 }
 0x268   : > { %v770_v5 = vpop.permute.xlu1 %769  ;;  %v768_v6 = vpop.permute.xlu0 %767 }
 0x269   : > { %v774_v7 = vrot.slane %v770_v5, 4  ;;  %v773_v8 = vrot.slane %v768_v6, 4 }
 0x26b   : > { %v779_v9 = vsel %vm775_vm6, %v770_v5, %v774_v7  ;;  %v778_v10 = vsel %vm775_vm6, %v768_v6, %v773_v8 }
 0x26c   : > { %787 = vst [vmem:[#allocation4 + $0x2c] sm:$0xf] %v779_v9 }
 0x26d   : > { %786 = vst [vmem:[#allocation4 + $0x28] sm:$0xf] %v778_v10 }
 0x26e PF: > { %v1468_v12 = vmov 0   ;;  %v1256_v13 = vld [vmem:[#allocation4 + $0x20] sm:$0xff]  ;;  %v804_v15 = vld [vmem:[%s1619_s25] sm:$0xff]  ;;  %v1255_v16 = vld [vmem:[#allocation4 + $0x18] sm:$0xff]  ;;  %vm874_vm8 = vcmask 785408   ;;  %vm944_vm9 = vcmask 261120  }
 0x26f   : > { %1361 = vset.pattern.permute.xlu0 %v1468_v12  ;;  %1362 = vset.pattern.permute.xlu1 %v1468_v12  ;;  %v806_v14 = vld [vmem:[%s1619_s25 + $0x10] sm:$0xff]  ;;  %v807_v17 = vld [vmem:[%s1619_s25 + $0x18] sm:$0xff]  ;;  %v805_v18 = vld [vmem:[%s1619_s25 + $0x8] sm:$0xff]  ;;  %v975_v55 = vperm.slane %v1609_v0, 0 }
 0x270   : > { %820 = vperm.xlu0 %1361, %v806_v14   ;;  %1363 = vset.pattern.permute.xlu2 %v1468_v12  ;;  %v1254_v19 = vld [vmem:[#allocation4 + $0x10] sm:$0xff]  ;;  %v1253_v20 = vld [vmem:[#allocation4 + $0x8] sm:$0xff]  ;;  %v912_v21 = vld [vmem:[%s1629_s24 + $0x10] sm:$0xff] }
 0x271   : > { %810 = vperm.xlu1 %1362, %v804_v15   ;;  %v913_v22 = vld [vmem:[%s1629_s24 + $0x18] sm:$0xff]  ;;  %v1252_v23 = vld [vmem:[#allocation4] sm:$0xff]  ;;  %v1251_v24 = vld [vmem:[%s1614_s30 + $0x8] sm:$0xff] }
 0x272   : > { %v1250_v25 = vld [vmem:[%s1614_s30] sm:$0xff]  ;;  %v911_v45 = vld [vmem:[%s1629_s24 + $0x8] sm:$0xff] }
 0x273   : > { %v910_v35 = vld [vmem:[%s1629_s24] sm:$0xff]  ;;  %v1259_v51 = vld [vmem:[%s1624_s28 + $0x8] sm:$0xff] }
 0x274   : > { %v1257_v11 = vld [vmem:[#allocation4 + $0x28] sm:$0xff]  ;;  %916 = vperm.xlu2 %1363, %v910_v35   ;;  %v1258_v50 = vld [vmem:[%s1624_s28] sm:$0xff] }
 0x275   : > { %1273 = vmatpush.bf16.msra.mxu2 %v1257_v11  ;;  %883 = vmatpush.bf16.msra.mxu0 %v1257_v11 }
 0x278   : > { %825 = vperm.xlu0 %1361, %v807_v17  }
 0x279   : > { %1274 = vmatpush.bf16.msra.mxu2 %v1256_v13  ;;  %884 = vmatpush.bf16.msra.mxu0 %v1256_v13 }
 0x27a   : > { %815 = vperm.xlu1 %1362, %v805_v18  }
 0x27c   : > { %921 = vperm.xlu2 %1363, %v911_v45  }
 0x27d   : > { %1275 = vmatpush.bf16.msra.mxu2 %v1255_v16  ;;  %885 = vmatpush.bf16.msra.mxu0 %v1255_v16 }
 0x280   : > { %926 = vperm.xlu0 %1361, %v912_v21  }
 0x281   : > { %1276 = vmatpush.bf16.msra.mxu2 %v1254_v19  ;;  %886 = vmatpush.bf16.msra.mxu0 %v1254_v19 }
 0x282   : > { %931 = vperm.xlu1 %1362, %v913_v22  }
 0x285   : > { %1277 = vmatpush.bf16.msra.mxu2 %v1253_v20  ;;  %887 = vmatpush.bf16.msra.mxu0 %v1253_v20 }
 0x289   : > { %1278 = vmatpush.bf16.msra.mxu2 %v1252_v23  ;;  %888 = vmatpush.bf16.msra.mxu0 %v1252_v23 }
 0x28c   : > { %1225 = vmatmul.msk.bf16.vlgmr.msra.gmra.mxu2 %vm874_vm8, %v1251_v24  ;;  %1224 = vmatmul.msk.bf16.vlgmr.msra.gmra.mxu0 %vm874_vm8, %v1250_v25 }
 0x2ce   : > { %v917_v52 = vpop.permute.xlu2 %916 }
 0x2d6   : > { %v922_v58 = vpop.permute.xlu2 %921 }
 0x2e2   : > { %v821_v30 = vpop.permute.xlu0 %820 }
 0x2e3   : > { %v811_v31 = vpop.permute.xlu1 %810 }
 0x2ea   : > { %v826_v36 = vpop.permute.xlu0 %825 }
 0x2ec   : > { %v816_v38 = vpop.permute.xlu1 %815 }
 0x2f2   : > { %v927_v63 = vpop.permute.xlu0 %926 }
 0x2f4   : > { %v932_v5 = vpop.permute.xlu1 %931 }
 0x309   : > { %v890_v26 = vpop.f32.mrf.mxu0 }
 0x30a   : > { %v891_v40 = vadd.f32 %v890_v26, %v811_v31 }
 0x30c   : > { %v900_v46 = vmax.f32 %v891_v40, 0.0 }
 0x30f   : > { %v895_v32 = vpop.f32.mrf.mxu2 }
 0x310   : > { %v896_v37 = vadd.f32 %v895_v32, %v821_v30 }
 0x311   : > { %v892_v34 = vpop.f32.mrf.mxu0 }
 0x312   : > { %v893_v41 = vadd.f32 %v892_v34, %v816_v38  ;;  %v902_v43 = vmax.f32 %v896_v37, 0.0 }
 0x314   : > { %v901_v47 = vmax.f32 %v893_v41, 0.0 }
 0x316   : > { %v908_v49 = vpack.c.bf16 %v901_v47, %v900_v46 }
 0x317   : > { %v897_v39 = vpop.f32.mrf.mxu2 }
 0x318   : > { %v898_v42 = vadd.f32 %v897_v39, %v826_v36 }
 0x31a   : > { %v903_v44 = vmax.f32 %v898_v42, 0.0 }
 0x31c   : > { %v909_v48 = vpack.c.bf16 %v903_v44, %v902_v43 }
 0x31e   : > { %957 = vmatpush.bf16.msra.mxu1 %v909_v48 }
 0x322   : > { %958 = vmatpush.bf16.msra.mxu1 %v908_v49 }
 0x325   : > { %1234 = vmatmul.msk.bf16.vlgmr.msra.gmra.mxu1 %vm944_vm9, %v1258_v50 }
 0x335   : > { %1235 = vmatmul.msk.bf16.gmra.mxu1 %vm944_vm9, %v1259_v51 }
 0x3a2   : > { %v960_v53 = vpop.f32.mrf.mxu1 }
 0x3a3   : > { %v961_v54 = vadd.f32 %v960_v53, %v917_v52 }
 0x3a5   : > { %v970_v56 = vadd.f32 %v961_v54, %v1653_v27 }
 0x3a7   : > { %v977_v57 = vmul.f32 %v975_v55, %v970_v56 }
 0x3a9   : > { %981 = vst [vmem:[#allocation2 + $0x10] sm:$0xff] %v977_v57 }
 0x3aa   : > { %v962_v59 = vpop.f32.mrf.mxu1 }
 0x3ab   : > { %v963_v60 = vadd.f32 %v962_v59, %v922_v58 }
 0x3ad   : > { %v971_v61 = vadd.f32 %v963_v60, %v1655_v28 }
 0x3af   : > { %v978_v62 = vmul.f32 %v975_v55, %v971_v61 }
 0x3b1   : > { %982 = vst [vmem:[#allocation2] sm:$0xff] %v978_v62 }
 0x3b2   : > { %v965_v1 = vpop.f32.mrf.mxu1 }
 0x3b3   : > { %v966_v2 = vadd.f32 %v965_v1, %v927_v63 }
 0x3b5   : > { %v972_v3 = vadd.f32 %v966_v2, %v1657_v29 }
 0x3b7   : > { %v979_v4 = vmul.f32 %v975_v55, %v972_v3 }
 0x3b9   : > { %983 = vst [vmem:[#allocation2 + $0x18] sm:$0xff] %v979_v4 }
 0x3ba   : > { %v967_v0 = vpop.f32.mrf.mxu1 }
 0x3bb   : > { %v968_v6 = vadd.f32 %v967_v0, %v932_v5 }
 0x3bd   : > { %v973_v27 = vadd.f32 %v968_v6, %v1665_v33  ;;  %987 = sbr.rel (%p1191_p2) target bundleno = 1105 (0x451), region = 80 }
 0x3bf   : > { %v980_v7 = vmul.f32 %v975_v55, %v973_v27 }
 0x3c1   : > { %984 = vst [vmem:[#allocation2 + $0x8] sm:$0xff] %v980_v7 }
 0x3c2   : > { %v990_v28 = vpack.c.bf16 %v980_v7, %v979_v4  ;;  %v991_v8 = vld [vmem:[%s1776_s9] sm:$0xff]  ;;  %v1469_v9 = vmov 0   ;;  %v989_v29 = vpack.c.bf16 %v978_v62, %v977_v57 }
 0x3c3   : > { %1364 = vset.pattern.permute.xlu0 %v1469_v9  ;;  %v988_v33 = vld [vmem:[%s1775_s8] sm:$0xf] }
 0x3c4   : > { %1006 = vmatpush.bf16.msra.mxu0 %v990_v28  ;;  %994 = vperm.xlu0 %1364, %v991_v8  }
 0x3c8   : > { %1007 = vmatpush.bf16.msra.mxu0 %v989_v29 }
 0x3cb   : > { %1237 = vmatmul.msk.bf16.vlgmr.msra.gmra.mxu0 %vm944_vm9, %v988_v33 }
 0x436   : > { %v995_v10 = vpop.permute.xlu0 %994 }
 0x448   : > { %v1009_v11 = vpop.f32.mrf.mxu0 }
 0x449   : > { %v1010_v12 = vadd.f32 %v1009_v11, %v995_v10 }
 0x44b   : > { %v1013_v13 = vmul.f32 %v1010_v12, %v975_v55 }
 0x44d   : > { %1014 = vst [vmem:[%s435_s22] sm:$0xff] %v1013_v13 }
 0x450   : > { %v1011_v14 = vpop.f32.mrf.mxu0 }
 0x451 PF: > { %s1239_s21 = sshll.u32 %s1447_s17, 3  ;;  %s1804_s12 = sld [smem:[#allocation18_spill]] }
 0x452   : > { %s1028_s23 = sshll.u32 %s435_s22, 4  ;;  %s1805_s15 = sand.u32 1, %s1435_s14   ;;  %s1029_s23 = int_to_ptr.vmem [resolvable:$true] %s1028_s23 }
 0x453   : > { %s1016_s20 = scalar_lea.sflag [#allocation6], %s1805_s15 }
 0x457   : > { %s1026_s19 = scalar_lea.hbm %s1804_s12, %s1239_s21  ;;  %s1385_s25 = scalar_lea.hbm %s1804_s12, 16 }
 0x458   : > { %s1030_s10 = sshll.u32 %s1026_s19, 4  ;;  %s1031_s10 = int_to_ptr.hbm [resolvable:$true] %s1030_s10 }
 0x459   : > { %s1379_s26 = sshra.s32 %s1031_s10, 4  ;;  %s1380_s26 = int_to_ptr.hbm [resolvable:$true] %s1379_s26 }
 0x45a   : > { %s1381_s13 = scalar_lea.hbm %s1380_s26, 8  ;;  %p1386_p7 = scmp.lt.s32.totalorder %s1380_s26, %s1804_s12 }
 0x45b   : > { %p1382_p4 = scmp.ne.s32.totalorder %s1380_s26, %s1381_s13  ;;  %p1387_p8 = scmp.lt.s32.totalorder %s1385_s25, %s1381_s13 }
 0x45d   : > { %p1383_p5 = pnand %p1382_p4, %p1574_p3  ;;  %p1388_p10 = por %p1387_p8, %p1386_p7 }
 0x45f   : > { %p1384_p6 = pneg %p1383_p5 }
 0x461   : > { %p1389_p11 = pnand %p1388_p10, %p1384_p6 }
 0x463   : > { %1392 = shalt.err (!%p1389_p11)
}
 0x464   : > { %1279 = dma.vmem_to_hbm [thread:$0]  (%p1574_p3), %s1029_s23, 128, %s1031_s10, %s1016_s20  }
 0x465 PF: > { %s1806_s11 = sld [smem:[#allocation12_spill]] }
 0x466   : > { %s1807_s22 = sld [smem:[#allocation8_spill]] }
 0x46b   : > { %p1285_p12 = scmp.ge.s32.totalorder %s1806_s11, 2 }
 0x46c   : > { %s1042_s21 = sand.u32 1, %s1807_s22  }
 0x46d   : > { %p1282_p13 = pnand %p1285_p12, %p1584_p9  ;;  %s1043_s27 = scalar_lea.sflag [#allocation6], %s1042_s21 }
 0x46f   : > { %p1283_p0 = pneg %p1282_p13 }
 0x471   : > { %1426 = dma.done.wait (%p1283_p0), %s1043_s27, 128  }
 0x472   : > { %1428 = vsyncadd (%p1283_p0), %s1043_s27, 4294967168  ;;  %s23_s20 = sadd.s32 1, %s1806_s11   ;;  %s1809_s18 = sld [smem:[#allocation9_spill]] }
 0x473   : > { %p20_p1 = scmp.ge.s32.totalorder %s23_s20, 8   ;;  %s1810_s15 = sld [smem:[#allocation17_spill]] }
 0x474   : > { %s1811_s16 = sld [smem:[#allocation10_spill]]  ;;  %s1815_s13 = smov %s1435_s14 }
 0x475   : > { %s1812_s17 = sld [smem:[#allocation11_spill]] }
 0x476   : > { %s1813_s19 = sld [smem:[#allocation13_spill]] }
 0x477   : > { %s1814_s23 = sld [smem:[#allocation15_spill]] }
 0x478   : > { %s1816_s14 = smov %s1809_s18 }
 0x479   :  { %22 = sbr.rel (!%p20_p1) target bundleno = 7 (0x7), region = 130 }
 0x47c   : > { %s1817_s18 = smov %s1813_s19 }
 0x47d   : > { %s1818_s19 = smov %s1814_s23 }
 0x47e   :  { %1049 = vsyncpa [#allocation6], 1 }
 0x47f   :  { %1051 = vsyncpa [#allocation6 + $0x1], 1 }

</bundles_post_ra>
